<compile_context>
chip_gen: v5e
topology: v5e:2x2
jax: 0.10.0
libtpu: 0.0.40
codegen_flags: <defaults>
</compile_context>

<pallas_src>
from dataclasses import dataclass
from fractions import Fraction

import numpy as np

import jax
import jax.numpy as jnp
from jax.experimental import pallas as pl
from jax.experimental.pallas import tpu as pltpu


@dataclass
class VideoTransformConfig:
    window_size: int = 2
    video_fps: float = 30.0
    video_freq_scale_range: tuple = (1.0, 1.0)
    video_freq_scale_p: float = 0.0
    video_freq_scale_dt: int = 10


_PALLAS_MIN_BYTES = 128 * 1024  # below this, a fused XLA lerp beats the kernel launch


# ----------------------------------------------------------------------------------
# Host-side "plan": which two source timesteps each output frame blends and with what
# weight (numerator / denom).  Mirrors the PyTorch module's numpy RNG / Fraction logic.
# ----------------------------------------------------------------------------------
def make_resample_plan(cfg: VideoTransformConfig, num_timesteps: int, np_rng):
    wsz = cfg.window_size

    def identity_plan():
        idx0 = np.arange(wsz, dtype=np.int32)
        return idx0, idx0.copy(), np.zeros(wsz, dtype=np.int32), 1

    if cfg.video_freq_scale_range == (1.0, 1.0):
        return identity_plan()

    freq_scale = np_rng.choice(
        [1.0, np_rng.uniform(*cfg.video_freq_scale_range)],
        p=[1.0 - cfg.video_freq_scale_p, cfg.video_freq_scale_p],
    )
    if freq_scale == 1.0:
        return identity_plan()

    frac = Fraction(float(freq_scale)).limit_denominator(cfg.video_freq_scale_dt)
    numer, denom = frac.numerator, frac.denominator
    required_timesteps = int(np.ceil((wsz - 1) * numer / denom)) + 1
    if required_timesteps > num_timesteps or (denom == 1 and numer == 1):
        return identity_plan()

    resampled_timesteps = (required_timesteps - 1) * denom + 1
    window_resampled_timesteps = (wsz - 1) * numer + 1
    rand_start = int(np_rng.integers(0, resampled_timesteps - (window_resampled_timesteps - 1)))

    # position of output frame k on the fine (resampled) grid; source coord = pos / denom
    pos = rand_start + np.arange(wsz, dtype=np.int64) * numer
    idx0 = (pos // denom).astype(np.int32)
    wnum = (pos % denom).astype(np.int32)
    idx1 = np.minimum(idx0 + 1, required_timesteps - 1).astype(np.int32)
    return idx0, idx1, wnum, denom


def _round_up(x, m):
    return (x + m - 1) // m * m


def _choose_f_tile(F, tsrc, wsz, src_itemsize, out_itemsize):
    """Feature-tile size (multiple of 128 lanes) sized against the real VMEM budget.

    Double-buffered footprint per lane = 2 * (tsrc*src_bytes + wsz*out_bytes); the
    blend matrix is tiny and resident.  Capped so F splits into >=2 tiles whenever
    possible (megacore work on v7x + read/compute/write overlap on every generation).
    """
    F128 = _round_up(F, 128)
    try:
        vmem_cap = pltpu.get_tpu_info().vmem_capacity_bytes
    except Exception:  # pragma: no cover - e.g. interpret mode off-TPU
        vmem_cap = 64 * 1024 * 1024
    budget = min(8 * 1024 * 1024, vmem_cap // 8)  # stay well under the scoped default
    per_lane = max(1, 2 * (tsrc * src_itemsize + wsz * out_itemsize))
    max_tile = max(128, (budget // per_lane) // 128 * 128)
    two_tile = max(128, _round_up(pl.cdiv(F128, 2), 128))  # prefer >= 2 feature tiles
    return int(min(max_tile, F128, two_tile))


# ----------------------------------------------------------------------------------
# Pallas kernel: one grid step per lane-dense feature tile; the whole source window
# lives in VMEM and all window_size output rows come out of a single MXU matmul.
# ----------------------------------------------------------------------------------
def temporal_resample(nir_imgs, ppg_labels, idx0, idx1, wnum, denom, force_pallas=False):
    T, C, H, W = nir_imgs.shape
    assert jnp.issubdtype(nir_imgs.dtype, jnp.floating), "interpolation needs float frames"

    idx0 = np.asarray(idx0, dtype=np.int64)
    idx1 = np.asarray(idx1, dtype=np.int64)
    wnum = np.asarray(wnum, dtype=np.int64)
    wsz = int(idx0.shape[0])

    # Only the frames actually referenced need to be DMA'd.
    t_lo = int(min(idx0.min(), idx1.min()))
    t_hi = int(max(idx0.max(), idx1.max())) + 1
    Tsrc = t_hi - t_lo
    assert t_hi <= T, "resample plan references frames beyond the input"
    assert ppg_labels.shape[0] >= t_hi, "ppg_labels shorter than required source window"

    w_np = (wnum.astype(np.float64) / float(denom)).astype(np.float32)

    # PPG labels are (T, 1): a handful of scalars -> blend in plain JAX.
    w_ppg = jnp.asarray(w_np.reshape(wsz, 1))
    p0 = ppg_labels[idx0].astype(jnp.float32)
    p1 = ppg_labels[idx1].astype(jnp.float32)
    ppg_out = ((1.0 - w_ppg) * p0 + w_ppg * p1).astype(ppg_labels.dtype)

    F = C * H * W
    itemsize = nir_imgs.dtype.itemsize
    total_bytes = (Tsrc + wsz) * F * itemsize

    if (not force_pallas) and total_bytes < _PALLAS_MIN_BYTES:
        # Tiny frames: kernel launch / grid setup / DMA prologue dwarf the work.
        w4 = jnp.asarray(w_np.reshape(wsz, 1, 1, 1))
        f0 = nir_imgs[idx0].astype(jnp.float32)
        f1 = nir_imgs[idx1].astype(jnp.float32)
        img_out = ((1.0 - w4) * f0 + w4 * f1).astype(nir_imgs.dtype)
        return img_out, ppg_out

    # Lane-dense source window, no padding (ragged last tile handled by Pallas).
    src = nir_imgs[t_lo:t_hi].reshape(Tsrc, F)

    # Host-built blend matrix: out = B @ src.
    blend = np.zeros((wsz, Tsrc), dtype=np.float32)
    for k in range(wsz):
        blend[k, idx0[k] - t_lo] += np.float32(1.0) - w_np[k]
        blend[k, idx1[k] - t_lo] += w_np[k]
    b_mat = jnp.asarray(blend)

    f_tile = _choose_f_tile(F, Tsrc, wsz, itemsize, itemsize)
    n_tiles = pl.cdiv(F, f_tile)
    compute_bf16 = nir_imgs.dtype == jnp.bfloat16

    def kernel(b_ref, src_ref, out_ref):
        src_blk = src_ref[...]
        if compute_bf16:
            # bf16 MXU inputs with f32 accumulation (native on every generation).
            acc = jnp.dot(
                b_ref[...].astype(jnp.bfloat16),
                src_blk,
                preferred_element_type=jnp.float32,
            )
        else:
            # f32 path: HIGHEST keeps the MXU decomposition at ~1e-6 error.
            acc = jnp.dot(
                b_ref[...],
                src_blk,
                preferred_element_type=jnp.float32,
                precision=jax.lax.Precision.HIGHEST,
            )
        out_ref[...] = acc.astype(out_ref.dtype)

    cost = pl.CostEstimate(
        flops=2 * wsz * Tsrc * F,
        transcendentals=0,
        bytes_accessed=(Tsrc + wsz) * F * itemsize + wsz * Tsrc * 4,
    )

    img_flat = pl.pallas_call(
        kernel,
        out_shape=jax.ShapeDtypeStruct((wsz, F), nir_imgs.dtype),
        grid=(n_tiles,),
        in_specs=[
            # per-call blend matrix (tiny, resident across the grid)
            pl.BlockSpec((wsz, Tsrc), lambda j: (0, 0)),
            # whole source window for this feature tile, one contiguous DMA
            pl.BlockSpec((Tsrc, f_tile), lambda j: (0, j)),
        ],
        out_specs=pl.BlockSpec((wsz, f_tile), lambda j: (0, j)),
        compiler_params=pltpu.CompilerParams(dimension_semantics=("parallel",)),
        cost_estimate=cost,
    )(b_mat, src)

    img_out = img_flat.reshape(wsz, C, H, W)
    return img_out, ppg_out


def video_transform_forward(cfg: VideoTransformConfig, all_nir_imgs, all_ppg_labels, np_rng):
    # TODO(synk): host-side numpy RNG + Fraction rational arithmetic stay on host;
    # only the interpolation / gather hot path runs in the Pallas kernel.
    idx0, idx1, wnum, denom = make_resample_plan(cfg, all_nir_imgs.shape[0], np_rng)
    wsz = cfg.window_size
    is_identity = (
        denom == 1
        and not np.any(wnum)
        and np.array_equal(idx0, np.arange(wsz, dtype=np.int32))
        and np.array_equal(idx1, idx0)
    )
    if is_identity:
        # Common path (default config / freq_scale==1 / too few frames): a plain
        # contiguous slice -- no kernel launch, no redundant DMAs or multiply-adds.
        return all_nir_imgs[:wsz], all_ppg_labels[:wsz]
    return temporal_resample(all_nir_imgs, all_ppg_labels, idx0, idx1, wnum, denom)


def _ref_resample(nir_np, ppg_np, idx0, idx1, wnum, denom):
    w = (np.asarray(wnum).astype(np.float64) / float(denom)).reshape(-1, 1, 1, 1)
    img = (1.0 - w) * nir_np[idx0] + w * nir_np[idx1]
    wp = w.reshape(-1, 1)
    ppg = (1.0 - wp) * ppg_np[idx0] + wp * ppg_np[idx1]
    return img.astype(nir_np.dtype), ppg.astype(ppg_np.dtype)


if __name__ == "__main__":
    key = jax.random.PRNGKey(0)
    k1, k2 = jax.random.split(key)

    # F = C*H*W = 4096 lanes -> two lane-dense feature tiles, Pallas path.
    T, C, H, W = 16, 1, 64, 64
    all_nir_imgs = jax.random.uniform(k1, (T, C, H, W), dtype=jnp.float32)
    all_ppg_labels = jax.random.normal(k2, (T, 1), dtype=jnp.float32)
    nir_np = np.asarray(all_nir_imgs)
    ppg_np = np.asarray(all_ppg_labels)

    # --- Path 1: default config -> identity short-circuit (plain slice) --------------
    cfg_default = VideoTransformConfig(window_size=8)
    np_rng = np.random.default_rng(0)
    nir1, ppg1 = video_transform_forward(cfg_default, all_nir_imgs, all_ppg_labels, np_rng)
    jax.block_until_ready((nir1, ppg1))
    assert nir1.shape == (8, C, H, W) and ppg1.shape == (8, 1)
    np.testing.assert_allclose(np.asarray(nir1), nir_np[:8], rtol=1e-6, atol=1e-6)
    np.testing.assert_allclose(np.asarray(ppg1), ppg_np[:8], rtol=1e-6, atol=1e-6)

    # --- Path 2: frequency scaling enabled -> temporal resample Pallas kernel --------
    cfg_fs = VideoTransformConfig(
        window_size=8,
        video_freq_scale_range=(0.7, 1.3),
        video_freq_scale_p=1.0,
        video_freq_scale_dt=10,
    )
    np_rng = np.random.default_rng(0)
    nir2, ppg2 = video_transform_forward(cfg_fs, all_nir_imgs, all_ppg_labels, np_rng)
    jax.block_until_ready((nir2, ppg2))
    assert nir2.shape == (8, C, H, W) and ppg2.shape == (8, 1)
    plan = make_resample_plan(cfg_fs, T, np.random.default_rng(0))
    ref_img, ref_ppg = _ref_resample(nir_np, ppg_np, *plan)
    np.testing.assert_allclose(np.asarray(nir2), ref_img, rtol=1e-5, atol=1e-5)
    np.testing.assert_allclose(np.asarray(ppg2), ref_ppg, rtol=1e-5, atol=1e-5)

    # --- Path 3: explicit non-identity plan (guarantees the kernel itself executes) --
    idx0 = np.arange(8, dtype=np.int32)
    idx1 = np.minimum(idx0 + 1, T - 1).astype(np.int32)
    wnum = np.array([0, 3, 5, 7, 9, 2, 4, 6], dtype=np.int32)
    denom = 10
    nir3, ppg3 = temporal_resample(
        all_nir_imgs, all_ppg_labels, idx0, idx1, wnum, denom, force_pallas=True
    )
    jax.block_until_ready((nir3, ppg3))
    ref_img3, ref_ppg3 = _ref_resample(nir_np, ppg_np, idx0, idx1, wnum, denom)
    np.testing.assert_allclose(np.asarray(nir3), ref_img3, rtol=1e-5, atol=1e-5)
    np.testing.assert_allclose(np.asarray(ppg3), ref_ppg3, rtol=1e-5, atol=1e-5)

    # --- Path 4: ragged feature dim (F = 2500, not a 128-multiple) -> masked last tile
    Hr = Wr = 50
    nir_r = jax.random.uniform(jax.random.PRNGKey(3), (T, 1, Hr, Wr), dtype=jnp.float32)
    ppg_r = jax.random.normal(jax.random.PRNGKey(4), (T, 1), dtype=jnp.float32)
    nir4, ppg4 = temporal_resample(nir_r, ppg_r, idx0, idx1, wnum, denom, force_pallas=True)
    jax.block_until_ready((nir4, ppg4))
    ref_img4, ref_ppg4 = _ref_resample(np.asarray(nir_r), np.asarray(ppg_r), idx0, idx1, wnum, denom)
    np.testing.assert_allclose(np.asarray(nir4), ref_img4, rtol=1e-5, atol=1e-5)
    np.testing.assert_allclose(np.asarray(ppg4), ref_ppg4, rtol=1e-5, atol=1e-5)

    # --- Path 5: tiny frames -> fused XLA fallback (no pallas_call) -------------------
    nir_s = jax.random.uniform(jax.random.PRNGKey(5), (T, 1, 16, 16), dtype=jnp.float32)
    ppg_s = jax.random.normal(jax.random.PRNGKey(6), (T, 1), dtype=jnp.float32)
    nir5, ppg5 = temporal_resample(nir_s, ppg_s, idx0, idx1, wnum, denom)
    jax.block_until_ready((nir5, ppg5))
    ref_img5, ref_ppg5 = _ref_resample(np.asarray(nir_s), np.asarray(ppg_s), idx0, idx1, wnum, denom)
    np.testing.assert_allclose(np.asarray(nir5), ref_img5, rtol=1e-5, atol=1e-5)
    np.testing.assert_allclose(np.asarray(ppg5), ref_ppg5, rtol=1e-5, atol=1e-5)

    print("KERNEL_OK")
</pallas_src>

<mosaic_0001>
module attributes {stable_mosaic.version = 11 : i64} {
  func.func @kernel(%arg0: i32, %arg1: memref<8x9xf32, #tpu.memory_space<vmem>>, %arg2: memref<9x2048xf32, #tpu.memory_space<vmem>>, %arg3: memref<8x2048xf32, #tpu.memory_space<vmem>>) attributes {dimension_semantics = [#tpu.dimension_semantics<parallel>], iteration_bounds = array<i64: 2>, scalar_prefetch = 0 : i64, scratch_operands = 0 : i64, tpu.core_type = #tpu.core_type<tc>, window_params = [{pipeline_mode = #tpu.pipeline_mode<synchronous>, transform_indices = @transform_0, window_bounds = array<i64: 8, 9>}, {transform_indices = @transform_1, window_bounds = array<i64: 9, 2048>}, {transform_indices = @transform_2, window_bounds = array<i64: 8, 2048>}]} {
    %c0 = arith.constant 0 : index
    %c0_0 = arith.constant 0 : index
    %0 = vector.load %arg2[%c0, %c0_0] : memref<9x2048xf32, #tpu.memory_space<vmem>>, vector<9x2048xf32>
    %c0_1 = arith.constant 0 : index
    %c0_2 = arith.constant 0 : index
    %1 = vector.load %arg1[%c0_1, %c0_2] : memref<8x9xf32, #tpu.memory_space<vmem>>, vector<8x9xf32>
    %cst = arith.constant dense<0.000000e+00> : vector<8x2048xf32>
    %2 = tpu.matmul %1, %0, %cst {dimension_numbers = #tpu.dot_dimension_numbers<[1], [0], [0], [1], [0, 0, 1, 1], [], []>, precision = #tpu.contract_precision<fp32>} : vector<8x9xf32>, vector<9x2048xf32>, vector<8x2048xf32> -> vector<8x2048xf32>
    %c0_3 = arith.constant 0 : index
    %c0_4 = arith.constant 0 : index
    %3 = vector.load %arg3[%c0_3, %c0_4] : memref<8x2048xf32, #tpu.memory_space<vmem>>, vector<8x2048xf32>
    tpu.vector_store %arg3[%c0_3, %c0_4], %2 {strides = array<i32>} : memref<8x2048xf32, #tpu.memory_space<vmem>>, vector<8x2048xf32>,
    return
  }
  func.func @transform_0(%arg0: i32) -> (i32, i32) {
    %c0_i32 = arith.constant 0 : i32
    %c0_i32_0 = arith.constant 0 : i32
    %c0_i32_1 = arith.constant 0 : i32
    return %c0_i32, %c0_i32_0 : i32, i32
  }
  func.func @transform_1(%arg0: i32) -> (i32, i32) {
    %c0_i32 = arith.constant 0 : i32
    %c0_i32_0 = arith.constant 0 : i32
    return %c0_i32, %arg0 : i32, i32
  }
  func.func @transform_2(%arg0: i32) -> (i32, i32) {
    %c0_i32 = arith.constant 0 : i32
    %c0_i32_0 = arith.constant 0 : i32
    return %c0_i32, %arg0 : i32, i32
  }
}

</mosaic_0001>

<bundles_post_ra>
// kernel: tpu_custom_call.1
= control target key start
LH: loop header
LB: loop body
LE: loop exit
PB: predicated region body
PF: predicated region fallthrough
CT: control target
= control target key end

     0   :  { %7 = vsyncpa [#allocation3], 0  ;;  %s3768_s0 = inlined_call_operand.hbm [shape: f32[8,9], index: 0, kind: input, shape index: {}]   ;;  %s3769_s1 = inlined_call_operand.hbm [shape: f32[9,4096], index: 1, kind: input, shape index: {}]   ;;  %s3770_s2 = inlined_call_operand.hbm [shape: f32[8,4096], index: 2, kind: output, shape index: {}]  }
   0x1   :  { %8 = vsyncpa [#allocation6], 0 }
   0x2   :  { %10 = vsyncpa [#allocation6 + $0x1], 0 }
   0x3   :  { %11 = vsyncpa [#allocation4], 0 }
   0x4   :  { %13 = vsyncpa [#allocation4 + $0x1], 0  ;;  %s3155_s9 = smov 0   ;;  %s3157_s10 = smov 0  }
   0x5   :  { %s3159_s11 = smov 0   ;;  %s3161_s12 = smov 0  }
   0x6 LB: > { %s3176_s13 = sadd.s32 4294967295, %s3134_s12   ;;  %s2926_s14 = sadd.s32 4294967294, %s3134_s12   ;;  %s3134_s12 = sphi %s3161_s12, %s3781_s12   ;;  %s3130_s11 = sphi %s3159_s11, %s3780_s11   ;;  %s3126_s10 = sphi %s3157_s10, %s3779_s10   ;;  %s3122_s9 = sphi %s3155_s9, %s3778_s9  }
   0x7   : > { %s3180_s15 = sadd.s32 1, %s3134_s12   ;;  %s47_s16 = sadd.s32 1, %s3130_s11 }
   0x8   : > { %s44_s17 = ssub.s32 %s3134_s12, %s3180_s15  ;;  %p54_p0 = scmp.ne.s32.totalorder %s3130_s11, %s3126_s10 }
   0x9   : > { %p45_p1 = scmp.eq.s32.totalorder %s44_s17, 0  ;;  %p55_p2 = scmp.eq.s32.totalorder %s3134_s12, 0 }
   0xa   : > { %p60_p3 = scmp.ne.s32.totalorder %s3126_s10, %s3122_s9  ;;  %p61_p4 = scmp.eq.s32.totalorder %s3176_s13, 0 }
   0xb   : > { %s3192_s18 = scalar_select %p45_p1, %s3130_s11, %s47_s16  }
   0xc   : > { %p3194_p5 = por %p55_p2, %p54_p0  ;;  %p3200_p6 = por %p61_p4, %p60_p3 }
   0xd   : > { %p84_p7 = scmp.eq.s32.totalorder %s3176_s13, 1  ;;  %p90_p8 = scmp.eq.s32.totalorder %s2926_s14, 1 }
   0xe   : > { %p2927_p9 = scmp.ge.s32.totalorder %s3134_s12, 1  ;;  %p97_p10 = scmp.lt.s32.totalorder %s3134_s12, 3 }
   0xf   : > { %p3207_p11 = por %p84_p7, %p54_p0  ;;  %p3211_p12 = por %p90_p8, %p60_p3 }
  0x10   : > { %p3215_p13 = pnand %p2927_p9, %p97_p10  ;;  %s109_s26 = sshll.u32 %s3768_s0, 4  ;;  %s110_s26 = int_to_ptr.hbm [resolvable:$true] %s109_s26 }
  0x11   : > { %s3136_s27 = smov [#allocation2]   ;;  %p2965_p3 = scmp.lt.s32.totalorder %s3134_s12, 2 }
  0x12   : > { %p2952_p1 = pneg %p3215_p13  ;;  %s111_s28 = sshll.u32 %s3136_s27, 4  ;;  %s112_s28 = int_to_ptr.vmem [resolvable:$true] %s111_s28 }
  0x13   : > { %s122_s29 = sand.u32 1, %s3130_s11   ;;  %p3231_p7 = pnand %p2965_p3, %p3194_p5 }
  0x14   : > { %p2953_p2 = pnand %p2952_p1, %p61_p4  ;;  %s2930_s3 = sshll.u32 %s122_s29, 8 }
  0x15   : > { %s2942_s4 = sshll.u32 %s3134_s12, 7  ;;  %s126_s14 = scalar_lea.vmem [#allocation5], %s2930_s3 }
  0x16   : > { %2955 = dma.hbm_to_vmem [thread:$0]  (!%p2953_p2), %s110_s26, 128, %s112_s28, [#allocation3]  }
  0x17   : > { %s131_s7 = scalar_lea.hbm %s3769_s1, %s2942_s4  ;;  %s134_s16 = sshll.u32 %s126_s14, 4  ;;  %s135_s16 = int_to_ptr.vmem [resolvable:$true] %s134_s16 }
  0x18   : > { %s132_s8 = sshll.u32 %s131_s7, 4  ;;  %s123_s17 = scalar_lea.sflag [#allocation6], %s122_s29  ;;  %s133_s8 = int_to_ptr.hbm [resolvable:$true] %s132_s8 }
  0x19   : > { %s3034_s24 = sshra.s32 %s133_s8, 4  ;;  %p3038_p8 = pneg %p3231_p7  ;;  %s3035_s24 = int_to_ptr.hbm [resolvable:$true] %s3034_s24 }
  0x1a   : > { %s3036_s19 = scalar_lea.hbm %s3035_s24, 256  ;;  %s3041_s27 = scalar_lea.hbm %s3769_s1, 512 }
  0x1b   : > { %p3037_p5 = scmp.ne.s32.totalorder %s3035_s24, %s3036_s19  ;;  %p3042_p1 = scmp.lt.s32.totalorder %s3035_s24, %s3769_s1 }
  0x1c   : > { %p3043_p2 = scmp.lt.s32.totalorder %s3041_s27, %s3036_s19 }
  0x1d   : > { %p3039_p9 = pnand %p3038_p8, %p3037_p5 }
  0x1e   : > { %p3044_p3 = por %p3043_p2, %p3042_p1 }
  0x1f   : > { %p3040_p10 = pneg %p3039_p9 }
  0x21   : > { %p3045_p0 = pnand %p3044_p3, %p3040_p10 }
  0x23   : > { %3048 = shalt.err (!%p3045_p0)
}
  0x24   : > { %s3137_s29 = smov 4096   ;;  %s3138_s3 = smov 2048  }
  0x25   : > { %s3139_s5 = smov 128   ;;  %146 = sbr.rel (%p3215_p13) target bundleno = 381 (0x17d), region = 28 }
  0x26   : > { %2959 = dma.hbm_to_vmem [thread:$0]  (!%p3231_p7), %s133_s8, 4096, %s135_s16, %s123_s17, %s3137_s29, %s3138_s3, %s3139_s5  }
  0x2a   : > { %3109 = dma.done.wait (%p61_p4), [#allocation3], 128  }
  0x2b   : > { %3111 = vsyncadd (%p61_p4), [#allocation3], 4294967168  ;;  %s3256_s6 = sand.u32 1, %s3126_s10  }
  0x2c   : > { %s2935_s7 = sshll.u32 %s3256_s6, 8  ;;  %s154_s14 = scalar_lea.sflag [#allocation6], %s3256_s6 }
  0x2d   : > { %s3260_s24 = scalar_lea.vmem [#allocation5], %s2935_s7 }
  0x2e   : > { %3113 = dma.done.wait (%p3200_p6), %s154_s14, 4096  }
  0x2f   : > { %3115 = vsyncadd (%p3200_p6), %s154_s14, 4294963200  ;;  %vm218_vm0 = vcmask 1040384   ;;  %vm214_vm1 = vcmask 72704   ;;  %v197_v0 = vld [vmem:[%s3260_s24 + $0x80] sm:$0x1]  ;;  %v213_v2 = vld [vmem:[#allocation2] sm:$0xff] }
  0x30   : > { %v181_v1 = vld [vmem:[%s3260_s24] sm:$0xff]  ;;  %v220_v3 = vsel %vm218_vm0, %v197_v0, 0  ;;  %v216_v5 = vsel %vm214_vm1, %v213_v2, 0  ;;  %v198_v6 = vld [vmem:[%s3260_s24 + $0x88] sm:$0x1]  ;;  %v183_v21 = vld [vmem:[%s3260_s24 + $0x10] sm:$0xff] }
  0x31   : > { %v3269_v4 = vand.u32 4294901760, %v181_v1  ;;  %v182_v7 = vld [vmem:[%s3260_s24 + $0x8] sm:$0xff]  ;;  %v281_v8 = vand.u32 4294901760, %v220_v3  ;;  %v3273_v9 = vand.u32 4294901760, %v216_v5  ;;  %v223_v10 = vsel %vm218_vm0, %v198_v6, 0  ;;  %v184_v36 = vld [vmem:[%s3260_s24 + $0x18] sm:$0xff] }
  0x32   : > { %v3276_v11 = vand.u32 4294901760, %v182_v7  ;;  %v199_v12 = vld [vmem:[%s3260_s24 + $0x90] sm:$0x1]  ;;  %v440_v14 = vand.u32 4294901760, %v223_v10  ;;  %v200_v16 = vld [vmem:[%s3260_s24 + $0x98] sm:$0x1] }
  0x33   : > { %v315_v13 = vsub.f32 %v181_v1, %v3269_v4  ;;  %v226_v15 = vsel %vm218_vm0, %v199_v12, 0  ;;  %v309_v17 = vsub.f32 %v220_v3, %v281_v8  ;;  %366 = vmatpush.msra.mxu3 %v281_v8  ;;  %282 = vmatpush.msra.mxu0 %v281_v8  ;;  %v3283_v18 = vsub.f32 %v216_v5, %v3273_v9  ;;  %v201_v56 = vld [vmem:[%s3260_s24 + $0xa0] sm:$0x1]  ;;  %v202_v58 = vld [vmem:[%s3260_s24 + $0xa8] sm:$0x1]  ;;  %s2936_s20 = sshll.u32 %s3256_s6, 7 }
  0x34   : > { %v3286_v19 = vsub.f32 %v182_v7, %v3276_v11  ;;  %v3288_v20 = vand.u32 4294901760, %v226_v15  ;;  %v468_v22 = vsub.f32 %v223_v10, %v440_v14  ;;  %v229_v24 = vsel %vm218_vm0, %v200_v16, 0  ;;  %v185_v63 = vld [vmem:[%s3260_s24 + $0x20] sm:$0xff]  ;;  %v186_v1 = vld [vmem:[%s3260_s24 + $0x28] sm:$0xff]  ;;  %s3641_s23 = scalar_lea.vmem [#allocation7], %s2936_s20  ;;  %s2943_s30 = sshll.u32 %s3176_s13, 7 }
  0x35   : > { %v316_v23 = vand.u32 4294901760, %v315_v13  ;;  %341 = vmatpush.msra.mxu2 %v309_v17  ;;  %368 = vmatpush.msra.mxu3 %v3269_v4  ;;  %v3294_v25 = vand.u32 4294901760, %v3283_v18  ;;  %v310_v26 = vand.u32 4294901760, %v309_v17  ;;  %v3301_v31 = vand.u32 4294901760, %v183_v21  ;;  %s2839_s17 = scalar_lea.hbm %s3770_s2, %s2943_s30  ;;  %s2841_s19 = sshll.u32 %s3641_s23, 4  ;;  %s2842_s19 = int_to_ptr.vmem [resolvable:$true] %s2841_s19 }
  0x36   : > { %v475_v27 = vand.u32 4294901760, %v3286_v19  ;;  %284 = vmatpush.msra.mxu0 %v3269_v4  ;;  %v469_v28 = vand.u32 4294901760, %v468_v22  ;;  %v3299_v30 = vsub.f32 %v226_v15, %v3288_v20  ;;  %v3307_v35 = vand.u32 4294901760, %v229_v24  ;;  %s2843_s25 = sshll.u32 %s2839_s17, 4  ;;  %s2828_s26 = scalar_lea.sflag [#allocation4], %s3256_s6  ;;  %s2844_s25 = int_to_ptr.hbm [resolvable:$true] %s2843_s25 }
  0x37   : > { %v317_v29 = vsub.f32 %v315_v13, %v316_v23  ;;  %344 = vmatpush.msra.mxu2 %v315_v13  ;;  %372 = vmatmul.f32.vlgmr.msra.gmra.mxu3 %v3294_v25  ;;  %v288_v32 = vsub.f32 %v3283_v18, %v3294_v25  ;;  %v311_v33 = vsub.f32 %v309_v17, %v310_v26  ;;  %v3316_v44 = vand.u32 4294901760, %v184_v36  ;;  %s3078_s13 = sshra.s32 %s2844_s25, 4  ;;  %s3084_s29 = scalar_lea.hbm %s3770_s2, 256  ;;  %s3079_s13 = int_to_ptr.hbm [resolvable:$true] %s3078_s13 }
  0x38   : > { %v476_v34 = vsub.f32 %v3286_v19, %v475_v27  ;;  %347 = vmatmul.f32.vlgmr.msra.gmra.mxu2 %v3283_v18  ;;  %393 = vmatpush.msrb.mxu0 %v310_v26  ;;  %v470_v37 = vsub.f32 %v468_v22, %v469_v28  ;;  %v3314_v43 = vsub.f32 %v183_v21, %v3301_v31  ;;  %v628_v45 = vand.u32 4294901760, %v3299_v30  ;;  %s3080_s27 = scalar_lea.hbm %s3079_s13, 128  ;;  %p3085_p0 = scmp.lt.s32.totalorder %s3079_s13, %s3770_s2 }
  0x39   : > { %441 = vmatpush.msrb.mxu2 %v440_v14  ;;  %v3311_v38 = vand.u32 4294901760, %v288_v32  ;;  %v312_v39 = vand.u32 4294901760, %v311_v33  ;;  %v318_v40 = vand.u32 4294901760, %v317_v29  ;;  %v3321_v46 = vsub.f32 %v229_v24, %v3307_v35  ;;  %v204_v24 = vld [vmem:[%s3260_s24 + $0xb8] sm:$0x1]  ;;  %p3081_p4 = scmp.ne.s32.totalorder %s3079_s13, %s3080_s27  ;;  %p3086_p7 = scmp.lt.s32.totalorder %s3084_s29, %s3080_s27 }
  0x3a   : > { %v471_v41 = vand.u32 4294901760, %v470_v37  ;;  %397 = vmatpush.msrb.mxu0 %v316_v23  ;;  %v477_v42 = vand.u32 4294901760, %v476_v34  ;;  %v3325_v47 = vsub.f32 %v184_v36, %v3316_v44  ;;  %v634_v48 = vand.u32 4294901760, %v3314_v43 }
  0x3b   : > { %290 = vmatmul.f32.vlgmr.msra.gmra.mxu0 %v3311_v38  ;;  %313 = vmatpush.msra.mxu1 %v312_v39  ;;  %v629_v49 = vsub.f32 %v3299_v30, %v628_v45  ;;  %v787_v50 = vand.u32 4294901760, %v3321_v46  ;;  %v232_v60 = vsel %vm218_vm0, %v201_v56, 0  ;;  %v235_v62 = vsel %vm218_vm0, %v202_v58, 0  ;;  %p3082_p6 = pnand %p3081_p4, %p3207_p11  ;;  %p3087_p5 = por %p3086_p7, %p3085_p0 }
  0x3c   : > { %472 = vmatpush.msrb.mxu3 %v471_v41  ;;  %443 = vmatpush.msrb.mxu2 %v3276_v11  ;;  %v793_v51 = vand.u32 4294901760, %v3325_v47  ;;  %v635_v52 = vsub.f32 %v3314_v43, %v634_v48  ;;  %v3358_v0 = vand.u32 4294901760, %v232_v60  ;;  %v3362_v2 = vand.u32 4294901760, %v235_v62 }
  0x3d   : > { %319 = vmatpush.msra.mxu1 %v318_v40  ;;  %500 = vmatpush.msra.mxu0 %v468_v22  ;;  %v630_v53 = vand.u32 4294901760, %v629_v49  ;;  %v788_v54 = vsub.f32 %v3321_v46, %v787_v50  ;;  %v3364_v3 = vand.u32 4294901760, %v185_v63  ;;  %v203_v22 = vld [vmem:[%s3260_s24 + $0xb0] sm:$0x1]  ;;  %p3083_p13 = pneg %p3082_p6 }
  0x3e   : > { %552 = vmatpush.msra.mxu2 %v469_v28  ;;  %321 = vmatmul.f32.vlgmr.msra.gmra.mxu1 %v3273_v9  ;;  %v794_v55 = vsub.f32 %v3325_v47, %v793_v51  ;;  %v636_v57 = vand.u32 4294901760, %v635_v52  ;;  %v945_v5 = vsub.f32 %v232_v60, %v3358_v0  ;;  %v3375_v6 = vsub.f32 %v235_v62, %v3362_v2  ;;  %v187_v28 = vld [vmem:[%s3260_s24 + $0x30] sm:$0xff]  ;;  %v206_v52 = vld [vmem:[%s3260_s24 + $0xc8] sm:$0x1] }
  0x3f   : > { %478 = vmatpush.msrb.mxu3 %v477_v42  ;;  %418 = vmatpush.msrb.mxu1 %v281_v8  ;;  %v789_v59 = vand.u32 4294901760, %v788_v54  ;;  %v951_v7 = vsub.f32 %v185_v63, %v3364_v3  ;;  %v238_v26 = vsel %vm218_vm0, %v203_v22, 0  ;;  %v3416_v32 = vand.u32 4294901760, %v187_v28  ;;  %p3088_p8 = pnand %p3087_p5, %p3083_p13 }
  0x40   : > { %480 = vmatmul.f32.vlgmr.msrb.gmra.mxu3 %v3273_v9  ;;  %449 = vmatmul.f32.vlgmr.msrb.gmra.mxu2 %v3311_v38  ;;  %v795_v61 = vand.u32 4294901760, %v794_v55  ;;  %v946_v10 = vand.u32 4294901760, %v945_v5  ;;  %v3411_v29 = vand.u32 4294901760, %v238_v26  ;;  %v247_v54 = vsel %vm218_vm0, %v206_v52, 0  ;;  %v189_v55 = vld [vmem:[%s3260_s24 + $0x40] sm:$0xff] }
  0x41   : > { %420 = vmatpush.msrb.mxu1 %v3269_v4  ;;  %577 = vmatpush.msra.mxu3 %v440_v14  ;;  %v3367_v4 = vand.u32 4294901760, %v186_v1  ;;  %v952_v12 = vand.u32 4294901760, %v951_v7  ;;  %v1269_v36 = vsub.f32 %v187_v28, %v3416_v32  ;;  %v3466_v58 = vand.u32 4294901760, %v247_v54 }
  0x42   : > { %556 = vmatpush.msra.mxu2 %v475_v27  ;;  %503 = vmatpush.msra.mxu0 %v3286_v19  ;;  %v241_v27 = vsel %vm218_vm0, %v204_v24, 0  ;;  %v1263_v34 = vsub.f32 %v238_v26, %v3411_v29 }
  0x43   : > { %525 = vmatpush.msra.mxu1 %v440_v14  ;;  %399 = vmatmul.f32.vlgmr.msrb.gmra.mxu0 %v3273_v9  ;;  %v3381_v8 = vsub.f32 %v186_v1, %v3367_v4  ;;  %v947_v14 = vsub.f32 %v945_v5, %v946_v10  ;;  %v953_v16 = vsub.f32 %v951_v7, %v952_v12  ;;  %v1270_v41 = vand.u32 4294901760, %v1269_v36 }
  0x44   : > { %579 = vmatpush.msra.mxu3 %v3276_v11  ;;  %659 = vmatpush.msrb.mxu2 %v3299_v30  ;;  %v188_v30 = vld [vmem:[%s3260_s24 + $0x38] sm:$0xff]  ;;  %v1264_v39 = vand.u32 4294901760, %v1263_v34  ;;  %v3479_v62 = vsub.f32 %v247_v54, %v3466_v58 }
  0x45   : > { %527 = vmatpush.msra.mxu1 %v3276_v11  ;;  %600 = vmatpush.msrb.mxu0 %v3288_v20  ;;  %v1105_v11 = vand.u32 4294901760, %v3375_v6  ;;  %v1111_v13 = vand.u32 4294901760, %v3381_v8  ;;  %v948_v19 = vand.u32 4294901760, %v947_v14  ;;  %v954_v21 = vand.u32 4294901760, %v953_v16 }
  0x46   : > { %422 = vmatmul.f32.vlgmr.msrb.gmra.mxu1 %v3273_v9  ;;  %684 = vmatpush.msrb.mxu3 %v3288_v20  ;;  %v3419_v33 = vand.u32 4294901760, %v188_v30 }
  0x47   : > { %631 = vmatpush.msrb.mxu1 %v630_v53  ;;  %602 = vmatpush.msrb.mxu0 %v3301_v31  ;;  %v1106_v15 = vsub.f32 %v3375_v6, %v1105_v11  ;;  %v1112_v17 = vsub.f32 %v3381_v8, %v1111_v13 }
  0x48   : > { %581 = vmatmul.f32.vlgmr.msra.gmra.mxu3 %v3273_v9  ;;  %558 = vmatmul.f32.vlgmr.msra.gmra.mxu2 %v3273_v9  ;;  %v3433_v37 = vsub.f32 %v188_v30, %v3419_v33 }
  0x49   : > { %662 = vmatpush.msrb.mxu2 %v3314_v43  ;;  %686 = vmatpush.msrb.mxu3 %v3301_v31  ;;  %v1113_v23 = vand.u32 4294901760, %v1112_v17  ;;  %v1265_v43 = vsub.f32 %v1263_v34, %v1264_v39 }
  0x4a   : > { %637 = vmatpush.msrb.mxu1 %v636_v57  ;;  %v1429_v42 = vand.u32 4294901760, %v3433_v37  ;;  %v190_v57 = vld [vmem:[%s3260_s24 + $0x48] sm:$0xff] }
  0x4b   : > { %759 = vmatpush.msra.mxu2 %v3307_v35  ;;  %506 = vmatmul.f32.vlgmr.msra.gmra.mxu0 %v3283_v18  ;;  %v3471_v60 = vand.u32 4294901760, %v190_v57 }
  0x4c   : > { %790 = vmatpush.msra.mxu3 %v789_v59  ;;  %711 = vmatpush.msra.mxu0 %v628_v45  ;;  %v1271_v45 = vsub.f32 %v1269_v36, %v1270_v41  ;;  %v3468_v59 = vand.u32 4294901760, %v189_v55 }
  0x4d   : > { %761 = vmatpush.msra.mxu2 %v3316_v44 }
  0x4e   : > { %796 = vmatpush.msra.mxu3 %v795_v61  ;;  %531 = vmatmul.f32.vlgmr.msra.gmra.mxu1 %v3294_v25  ;;  %v1272_v49 = vand.u32 4294901760, %v1271_v45  ;;  %v1587_v63 = vsub.f32 %v189_v55, %v3468_v59 }
  0x4f   : > { %715 = vmatpush.msra.mxu0 %v634_v48  ;;  %736 = vmatpush.msra.mxu1 %v3288_v20  ;;  %v1107_v20 = vand.u32 4294901760, %v1106_v15  ;;  %v208_v15 = vld [vmem:[%s3260_s24 + $0xd8] sm:$0x1] }
  0x50   : > { %690 = vmatmul.f32.vlgmr.msrb.gmra.mxu3 %v3294_v25  ;;  %665 = vmatmul.f32.vlgmr.msrb.gmra.mxu2 %v3283_v18  ;;  %v253_v17 = vsel %vm218_vm0, %v208_v15, 0 }
  0x51   : > { %895 = vmatpush.msrb.mxu3 %v3307_v35  ;;  %738 = vmatpush.msra.mxu1 %v3301_v31  ;;  %v3414_v31 = vand.u32 4294901760, %v241_v27  ;;  %v3518_v22 = vand.u32 4294901760, %v253_v17 }
  0x52   : > { %870 = vmatpush.msrb.mxu2 %v787_v50  ;;  %v205_v50 = vld [vmem:[%s3260_s24 + $0xc0] sm:$0x1] }
  0x53   : > { %897 = vmatpush.msrb.mxu3 %v3316_v44  ;;  %608 = vmatmul.f32.vlgmr.msrb.gmra.mxu0 %v3311_v38  ;;  %v244_v53 = vsel %vm218_vm0, %v205_v50, 0 }
  0x54   : > { %874 = vmatpush.msrb.mxu2 %v793_v51  ;;  %818 = vmatpush.msrb.mxu0 %v3321_v46  ;;  %v1430_v46 = vsub.f32 %v3433_v37, %v1429_v42  ;;  %v3463_v56 = vand.u32 4294901760, %v244_v53 }
  0x56   : > { %639 = vmatmul.f32.vlgmr.msrb.gmra.mxu1 %v3273_v9  ;;  %821 = vmatpush.msrb.mxu0 %v3325_v47  ;;  %v1266_v47 = vand.u32 4294901760, %v1265_v43  ;;  %v1431_v51 = vand.u32 4294901760, %v1430_v46  ;;  %v1581_v61 = vsub.f32 %v244_v53, %v3463_v56 }
  0x57   : > { %843 = vmatpush.msrb.mxu1 %v3307_v35  ;;  %v3427_v35 = vsub.f32 %v241_v27, %v3414_v31  ;;  %v3531_v27 = vsub.f32 %v253_v17, %v3518_v22 }
  0x58   : > { %798 = vmatmul.f32.vlgmr.msra.gmra.mxu3 %v3273_v9  ;;  %767 = vmatmul.f32.vlgmr.msra.gmra.mxu2 %v3311_v38  ;;  %v1582_v1 = vand.u32 4294901760, %v1581_v61 }
  0x59   : > { %1002 = vmatpush.msra.mxu3 %v3358_v0  ;;  %845 = vmatpush.msrb.mxu1 %v3316_v44  ;;  %v1423_v40 = vand.u32 4294901760, %v3427_v35 }
  0x5a   : > { %977 = vmatpush.msra.mxu2 %v945_v5  ;;  %v1583_v5 = vsub.f32 %v1581_v61, %v1582_v1 }
  0x5b   : > { %1004 = vmatpush.msra.mxu3 %v3364_v3  ;;  %717 = vmatmul.f32.vlgmr.msra.gmra.mxu0 %v3273_v9  ;;  %v1424_v44 = vsub.f32 %v3427_v35, %v1423_v40 }
  0x5c   : > { %980 = vmatpush.msra.mxu2 %v951_v7  ;;  %918 = vmatpush.msra.mxu0 %v3358_v0 }
  0x5d   : > { %v1425_v48 = vand.u32 4294901760, %v1424_v44  ;;  %v210_v44 = vld [vmem:[%s3260_s24 + $0xe8] sm:$0x1] }
  0x5e   : > { %740 = vmatmul.f32.vlgmr.msra.gmra.mxu1 %v3273_v9  ;;  %920 = vmatpush.msra.mxu0 %v3364_v3  ;;  %v259_v46 = vsel %vm218_vm0, %v210_v44, 0 }
  0x5f   : > { %949 = vmatpush.msra.mxu1 %v948_v19  ;;  %v191_v19 = vld [vmem:[%s3260_s24 + $0x50] sm:$0xff]  ;;  %v3570_v50 = vand.u32 4294901760, %v259_v46 }
  0x60   : > { %899 = vmatmul.f32.vlgmr.msrb.gmra.mxu3 %v3273_v9  ;;  %876 = vmatmul.f32.vlgmr.msrb.gmra.mxu2 %v3273_v9 }
  0x61   : > { %1108 = vmatpush.msrb.mxu3 %v1107_v20  ;;  %955 = vmatpush.msra.mxu1 %v954_v21  ;;  %v192_v21 = vld [vmem:[%s3260_s24 + $0x58] sm:$0xff]  ;;  %v3585_v54 = vsub.f32 %v259_v46, %v3570_v50 }
  0x62   : > { %1077 = vmatpush.msrb.mxu2 %v3362_v2  ;;  %v3523_v24 = vand.u32 4294901760, %v192_v21 }
  0x63   : > { %1114 = vmatpush.msrb.mxu3 %v1113_v23  ;;  %824 = vmatmul.f32.vlgmr.msrb.gmra.mxu0 %v3283_v18  ;;  %v3520_v23 = vand.u32 4294901760, %v191_v19 }
  0x64   : > { %1079 = vmatpush.msrb.mxu2 %v3367_v4  ;;  %1029 = vmatpush.msrb.mxu0 %v946_v10  ;;  %v1584_v10 = vand.u32 4294901760, %v1583_v5 }
  0x65   : > { %v1905_v28 = vsub.f32 %v191_v19, %v3520_v23 }
  0x66   : > { %849 = vmatmul.f32.vlgmr.msrb.gmra.mxu1 %v3294_v25  ;;  %1033 = vmatpush.msrb.mxu0 %v952_v12 }
  0x67   : > { %1054 = vmatpush.msrb.mxu1 %v3358_v0  ;;  %v3485_v0 = vsub.f32 %v190_v57, %v3471_v60 }
  0x68   : > { %1008 = vmatmul.f32.vlgmr.msra.gmra.mxu3 %v3294_v25  ;;  %983 = vmatmul.f32.vlgmr.msra.gmra.mxu2 %v3283_v18 }
  0x69   : > { %1213 = vmatpush.msra.mxu3 %v3362_v2  ;;  %1056 = vmatpush.msrb.mxu1 %v3364_v3  ;;  %v1588_v3 = vand.u32 4294901760, %v1587_v63 }
  0x6a   : > { %1188 = vmatpush.msra.mxu2 %v1105_v11 }
  0x6b   : > { %1215 = vmatpush.msra.mxu3 %v3367_v4  ;;  %926 = vmatmul.f32.vlgmr.msra.gmra.mxu0 %v3311_v38  ;;  %v1589_v7 = vsub.f32 %v1587_v63, %v1588_v3 }
  0x6c   : > { %1192 = vmatpush.msra.mxu2 %v1111_v13  ;;  %1136 = vmatpush.msra.mxu0 %v3375_v6  ;;  %v207_v13 = vld [vmem:[%s3260_s24 + $0xd0] sm:$0x1] }
  0x6d   : > { %v1590_v12 = vand.u32 4294901760, %v1589_v7  ;;  %v250_v16 = vsel %vm218_vm0, %v207_v13, 0  ;;  %v212_v13 = vld [vmem:[%s3260_s24 + $0xf8] sm:$0x1] }
  0x6e   : > { %957 = vmatmul.f32.vlgmr.msra.gmra.mxu1 %v3273_v9  ;;  %1139 = vmatpush.msra.mxu0 %v3381_v8  ;;  %v3515_v20 = vand.u32 4294901760, %v250_v16  ;;  %v265_v17 = vsel %vm218_vm0, %v212_v13, 0 }
  0x6f   : > { %1161 = vmatpush.msra.mxu1 %v3362_v2  ;;  %v1741_v2 = vand.u32 4294901760, %v3479_v62 }
  0x70   : > { %1116 = vmatmul.f32.vlgmr.msrb.gmra.mxu3 %v3273_v9  ;;  %1085 = vmatmul.f32.vlgmr.msrb.gmra.mxu2 %v3311_v38  ;;  %v1899_v26 = vsub.f32 %v250_v16, %v3515_v20 }
  0x71   : > { %1320 = vmatpush.msrb.mxu3 %v3411_v29  ;;  %1163 = vmatpush.msra.mxu1 %v3367_v4  ;;  %v1747_v4 = vand.u32 4294901760, %v3485_v0  ;;  %v1742_v6 = vsub.f32 %v3479_v62, %v1741_v2 }
  0x72   : > { %1295 = vmatpush.msrb.mxu2 %v1263_v34  ;;  %v1900_v30 = vand.u32 4294901760, %v1899_v26 }
  0x73   : > { %1322 = vmatpush.msrb.mxu3 %v3416_v32  ;;  %1035 = vmatmul.f32.vlgmr.msrb.gmra.mxu0 %v3273_v9  ;;  %v1748_v8 = vsub.f32 %v3485_v0, %v1747_v4  ;;  %v1743_v11 = vand.u32 4294901760, %v1742_v6 }
  0x74   : > { %1298 = vmatpush.msrb.mxu2 %v1269_v36  ;;  %1236 = vmatpush.msrb.mxu0 %v3411_v29  ;;  %v1901_v34 = vsub.f32 %v1899_v26, %v1900_v30 }
  0x75   : > { %v1749_v14 = vand.u32 4294901760, %v1748_v8 }
  0x76   : > { %1058 = vmatmul.f32.vlgmr.msrb.gmra.mxu1 %v3273_v9  ;;  %1238 = vmatpush.msrb.mxu0 %v3416_v32 }
  0x77   : > { %1267 = vmatpush.msrb.mxu1 %v1266_v47  ;;  %v193_v47 = vld [vmem:[%s3260_s24 + $0x60] sm:$0xff] }
  0x78   : > { %1217 = vmatmul.f32.vlgmr.msra.gmra.mxu3 %v3273_v9  ;;  %1194 = vmatmul.f32.vlgmr.msra.gmra.mxu2 %v3273_v9 }
  0x79   : > { %1426 = vmatpush.msra.mxu3 %v1425_v48  ;;  %1273 = vmatpush.msrb.mxu1 %v1272_v49  ;;  %v194_v49 = vld [vmem:[%s3260_s24 + $0x68] sm:$0xff] }
  0x7a   : > { %1395 = vmatpush.msra.mxu2 %v3414_v31  ;;  %v3575_v52 = vand.u32 4294901760, %v194_v49 }
  0x7b   : > { %1432 = vmatpush.msra.mxu3 %v1431_v51  ;;  %1142 = vmatmul.f32.vlgmr.msra.gmra.mxu0 %v3283_v18  ;;  %v3572_v51 = vand.u32 4294901760, %v193_v47 }
  0x7c   : > { %1397 = vmatpush.msra.mxu2 %v3419_v33  ;;  %1347 = vmatpush.msra.mxu0 %v1264_v39  ;;  %v1902_v39 = vand.u32 4294901760, %v1901_v34 }
  0x7d   : > { %v3589_v55 = vsub.f32 %v193_v47, %v3572_v51 }
  0x7e   : > { %1167 = vmatmul.f32.vlgmr.msra.gmra.mxu1 %v3294_v25  ;;  %1351 = vmatpush.msra.mxu0 %v1270_v41 }
  0x7f   : > { %1372 = vmatpush.msra.mxu1 %v3411_v29  ;;  %v3537_v29 = vsub.f32 %v192_v21, %v3523_v24  ;;  %v195_v21 = vld [vmem:[%s3260_s24 + $0x70] sm:$0xff] }
  0x80   : > { %1326 = vmatmul.f32.vlgmr.msrb.gmra.mxu3 %v3294_v25  ;;  %1301 = vmatmul.f32.vlgmr.msrb.gmra.mxu2 %v3283_v18 }
  0x81   : > { %1531 = vmatpush.msrb.mxu3 %v3414_v31  ;;  %1374 = vmatpush.msra.mxu1 %v3416_v32  ;;  %v1906_v32 = vand.u32 4294901760, %v1905_v28 }
  0x82   : > { %1506 = vmatpush.msrb.mxu2 %v1423_v40 }
  0x83   : > { %1533 = vmatpush.msrb.mxu3 %v3419_v33  ;;  %1244 = vmatmul.f32.vlgmr.msrb.gmra.mxu0 %v3311_v38  ;;  %v1907_v36 = vsub.f32 %v1905_v28, %v1906_v32 }
  0x84   : > { %1510 = vmatpush.msrb.mxu2 %v1429_v42  ;;  %1454 = vmatpush.msrb.mxu0 %v3427_v35  ;;  %v209_v42 = vld [vmem:[%s3260_s24 + $0xe0] sm:$0x1] }
  0x85   : > { %v1908_v41 = vand.u32 4294901760, %v1907_v36  ;;  %v256_v45 = vsel %vm218_vm0, %v209_v42, 0 }
  0x86   : > { %1275 = vmatmul.f32.vlgmr.msrb.gmra.mxu1 %v3273_v9  ;;  %1457 = vmatpush.msrb.mxu0 %v3433_v37  ;;  %v3567_v48 = vand.u32 4294901760, %v256_v45 }
  0x87   : > { %1479 = vmatpush.msrb.mxu1 %v3414_v31  ;;  %v2059_v31 = vand.u32 4294901760, %v3531_v27 }
  0x88   : > { %1434 = vmatmul.f32.vlgmr.msra.gmra.mxu3 %v3273_v9  ;;  %1403 = vmatmul.f32.vlgmr.msra.gmra.mxu2 %v3311_v38  ;;  %v3580_v53 = vsub.f32 %v256_v45, %v3567_v48 }
  0x89   : > { %1638 = vmatpush.msra.mxu3 %v3463_v56  ;;  %1481 = vmatpush.msrb.mxu1 %v3419_v33  ;;  %v2065_v33 = vand.u32 4294901760, %v3537_v29  ;;  %v2060_v35 = vsub.f32 %v3531_v27, %v2059_v31 }
  0x8a   : > { %1613 = vmatpush.msra.mxu2 %v1581_v61  ;;  %v2218_v57 = vand.u32 4294901760, %v3580_v53 }
  0x8b   : > { %1640 = vmatpush.msra.mxu3 %v3468_v59  ;;  %1353 = vmatmul.f32.vlgmr.msra.gmra.mxu0 %v3273_v9  ;;  %v2066_v37 = vsub.f32 %v3537_v29, %v2065_v33  ;;  %v2061_v40 = vand.u32 4294901760, %v2060_v35 }
  0x8c   : > { %1616 = vmatpush.msra.mxu2 %v1587_v63  ;;  %1554 = vmatpush.msra.mxu0 %v3463_v56  ;;  %v2219_v61 = vsub.f32 %v3580_v53, %v2218_v57 }
  0x8d   : > { %v2067_v43 = vand.u32 4294901760, %v2066_v37 }
  0x8e   : > { %1376 = vmatmul.f32.vlgmr.msra.gmra.mxu1 %v3273_v9  ;;  %1556 = vmatpush.msra.mxu0 %v3468_v59  ;;  %v2220_v5 = vand.u32 4294901760, %v2219_v61 }
  0x8f   : > { %1585 = vmatpush.msra.mxu1 %v1584_v10  ;;  %v211_v10 = vld [vmem:[%s3260_s24 + $0xf0] sm:$0x1] }
  0x90   : > { %1535 = vmatmul.f32.vlgmr.msrb.gmra.mxu3 %v3273_v9  ;;  %1512 = vmatmul.f32.vlgmr.msrb.gmra.mxu2 %v3273_v9  ;;  %v262_v16 = vsel %vm218_vm0, %v211_v10, 0 }
  0x91   : > { %1744 = vmatpush.msrb.mxu3 %v1743_v11  ;;  %1591 = vmatpush.msra.mxu1 %v1590_v12 }
  0x92   : > { %1713 = vmatpush.msrb.mxu2 %v3466_v58 }
  0x93   : > { %1750 = vmatpush.msrb.mxu3 %v1749_v14  ;;  %1460 = vmatmul.f32.vlgmr.msrb.gmra.mxu0 %v3283_v18 }
  0x94   : > { %1715 = vmatpush.msrb.mxu2 %v3471_v60  ;;  %1665 = vmatpush.msrb.mxu0 %v1582_v1 }
  0x96   : > { %1485 = vmatmul.f32.vlgmr.msrb.gmra.mxu1 %v3294_v25  ;;  %1669 = vmatpush.msrb.mxu0 %v1588_v3 }
  0x97   : > { %1690 = vmatpush.msrb.mxu1 %v3463_v56  ;;  %v3593_v56 = vsub.f32 %v194_v49, %v3575_v52 }
  0x98   : > { %1644 = vmatmul.f32.vlgmr.msra.gmra.mxu3 %v3294_v25  ;;  %1619 = vmatmul.f32.vlgmr.msra.gmra.mxu2 %v3283_v18 }
  0x99   : > { %1849 = vmatpush.msra.mxu3 %v3466_v58  ;;  %1692 = vmatpush.msrb.mxu1 %v3468_v59  ;;  %v2224_v59 = vand.u32 4294901760, %v3589_v55 }
  0x9a   : > { %1824 = vmatpush.msra.mxu2 %v1741_v2 }
  0x9b   : > { %1851 = vmatpush.msra.mxu3 %v3471_v60  ;;  %1562 = vmatmul.f32.vlgmr.msra.gmra.mxu0 %v3311_v38 }
  0x9c   : > { %1828 = vmatpush.msra.mxu2 %v1747_v4  ;;  %1772 = vmatpush.msra.mxu0 %v3479_v62 }
  0x9e   : > { %1593 = vmatmul.f32.vlgmr.msra.gmra.mxu1 %v3273_v9  ;;  %1775 = vmatpush.msra.mxu0 %v3485_v0  ;;  %v2225_v0 = vsub.f32 %v3589_v55, %v2224_v59 }
  0x9f   : > { %1797 = vmatpush.msra.mxu1 %v3466_v58  ;;  %v2377_v58 = vand.u32 4294901760, %v3585_v54 }
  0xa0   : > { %1752 = vmatmul.f32.vlgmr.msrb.gmra.mxu3 %v3273_v9  ;;  %1721 = vmatmul.f32.vlgmr.msrb.gmra.mxu2 %v3311_v38  ;;  %v2226_v8 = vand.u32 4294901760, %v2225_v0 }
  0xa1   : > { %1956 = vmatpush.msrb.mxu3 %v3515_v20  ;;  %1799 = vmatpush.msra.mxu1 %v3471_v60  ;;  %v2383_v60 = vand.u32 4294901760, %v3593_v56  ;;  %v2378_v63 = vsub.f32 %v3585_v54, %v2377_v58 }
  0xa2   : > { %1931 = vmatpush.msrb.mxu2 %v1899_v26  ;;  %v196_v26 = vld [vmem:[%s3260_s24 + $0x78] sm:$0xff] }
  0xa3   : > { %1958 = vmatpush.msrb.mxu3 %v3520_v23  ;;  %1671 = vmatmul.f32.vlgmr.msrb.gmra.mxu0 %v3273_v9  ;;  %v2384_v2 = vsub.f32 %v3593_v56, %v2383_v60  ;;  %v2379_v7 = vand.u32 4294901760, %v2378_v63 }
  0xa4   : > { %1934 = vmatpush.msrb.mxu2 %v1905_v28  ;;  %1872 = vmatpush.msrb.mxu0 %v3515_v20  ;;  %v3637_v28 = vand.u32 4294901760, %v265_v17 }
  0xa5   : > { %v2385_v12 = vand.u32 4294901760, %v2384_v2 }
  0xa6   : > { %1694 = vmatmul.f32.vlgmr.msrb.gmra.mxu1 %v3273_v9  ;;  %1874 = vmatpush.msrb.mxu0 %v3520_v23  ;;  %v3655_v34 = vsub.f32 %v265_v17, %v3637_v28 }
  0xa7   : > { %1903 = vmatpush.msrb.mxu1 %v1902_v39 }
  0xa8   : > { %1853 = vmatmul.f32.vlgmr.msra.gmra.mxu3 %v3273_v9  ;;  %1830 = vmatmul.f32.vlgmr.msra.gmra.mxu2 %v3273_v9  ;;  %v2695_v44 = vand.u32 4294901760, %v3655_v34 }
  0xa9   : > { %2062 = vmatpush.msra.mxu3 %v2061_v40  ;;  %1909 = vmatpush.msrb.mxu1 %v1908_v41 }
  0xaa   : > { %2031 = vmatpush.msra.mxu2 %v3518_v22 }
  0xab   : > { %2068 = vmatpush.msra.mxu3 %v2067_v43  ;;  %1778 = vmatmul.f32.vlgmr.msra.gmra.mxu0 %v3283_v18 }
  0xac   : > { %2033 = vmatpush.msra.mxu2 %v3523_v24  ;;  %1983 = vmatpush.msra.mxu0 %v1900_v30  ;;  %v3639_v30 = vand.u32 4294901760, %v195_v21 }
  0xae   : > { %1803 = vmatmul.f32.vlgmr.msra.gmra.mxu1 %v3294_v25  ;;  %1987 = vmatpush.msra.mxu0 %v1906_v32  ;;  %v3661_v36 = vsub.f32 %v195_v21, %v3639_v30 }
  0xaf   : > { %2008 = vmatpush.msra.mxu1 %v3515_v20 }
  0xb0   : > { %1962 = vmatmul.f32.vlgmr.msrb.gmra.mxu3 %v3294_v25  ;;  %1937 = vmatmul.f32.vlgmr.msrb.gmra.mxu2 %v3283_v18  ;;  %v2542_v45 = vand.u32 4294901760, %v3661_v36 }
  0xb1   : > { %2167 = vmatpush.msrb.mxu3 %v3518_v22  ;;  %2010 = vmatpush.msra.mxu1 %v3520_v23 }
  0xb2   : > { %2142 = vmatpush.msrb.mxu2 %v2059_v31  ;;  %v3645_v31 = vand.u32 4294901760, %v196_v26 }
  0xb3   : > { %2169 = vmatpush.msrb.mxu3 %v3523_v24  ;;  %1880 = vmatmul.f32.vlgmr.msrb.gmra.mxu0 %v3311_v38 }
  0xb4   : > { %2146 = vmatpush.msrb.mxu2 %v2065_v33  ;;  %2090 = vmatpush.msrb.mxu0 %v3531_v27  ;;  %v3665_v39 = vsub.f32 %v196_v26, %v3645_v31 }
  0xb6   : > { %1911 = vmatmul.f32.vlgmr.msrb.gmra.mxu1 %v3273_v9  ;;  %2093 = vmatpush.msrb.mxu0 %v3537_v29  ;;  %v2701_v47 = vand.u32 4294901760, %v3665_v39 }
  0xb7   : > { %2115 = vmatpush.msrb.mxu1 %v3518_v22 }
  0xb8   : > { %2070 = vmatmul.f32.vlgmr.msra.gmra.mxu3 %v3273_v9  ;;  %v291_v62 = vpop.f32.mrf.mxu0  ;;  %2039 = vmatmul.f32.vlgmr.msra.gmra.mxu2 %v3311_v38 }
  0xb9   : > { %2274 = vmatpush.msra.mxu3 %v3567_v48  ;;  %2117 = vmatpush.msrb.mxu1 %v3523_v24  ;;  %v3634_v24 = vand.u32 4294901760, %v262_v16 }
  0xba   : > { %2249 = vmatpush.msra.mxu2 %v3580_v53  ;;  %v373_v1 = vpop.f32.mrf.mxu3  ;;  %v2696_v53 = vsub.f32 %v3655_v34, %v2695_v44 }
  0xbb   : > { %2276 = vmatpush.msra.mxu3 %v3572_v51  ;;  %v322_v3 = vpop.f32.mrf.mxu1  ;;  %1989 = vmatmul.f32.vlgmr.msra.gmra.mxu0 %v3273_v9  ;;  %v348_v4 = vpop.f32.mrf.mxu2  ;;  %v3650_v32 = vsub.f32 %v262_v16, %v3634_v24 }
  0xbc   : > { %2252 = vmatpush.msra.mxu2 %v3589_v55  ;;  %v323_v6 = vadd.f32 %v322_v3, %v291_v62  ;;  %2190 = vmatpush.msra.mxu0 %v3567_v48 }
  0xbd   : > { %v2536_v42 = vand.u32 4294901760, %v3650_v32 }
  0xbe   : > { %v349_v11 = vadd.f32 %v348_v4, %v323_v6  ;;  %2012 = vmatmul.f32.vlgmr.msra.gmra.mxu1 %v3273_v9  ;;  %2192 = vmatpush.msra.mxu0 %v3572_v51 }
  0xbf   : > { %2221 = vmatpush.msra.mxu1 %v2220_v5 }
  0xc0   : > { %2171 = vmatmul.f32.vlgmr.msrb.gmra.mxu3 %v3273_v9  ;;  %v374_v14 = vadd.f32 %v373_v1, %v349_v11  ;;  %v400_v15 = vpop.f32.mrf.mxu0  ;;  %2148 = vmatmul.f32.vlgmr.msrb.gmra.mxu2 %v3273_v9 }
  0xc1   : > { %2380 = vmatpush.msrb.mxu3 %v2379_v7  ;;  %2227 = vmatpush.msra.mxu1 %v2226_v8 }
  0xc2   : > { %2349 = vmatpush.msrb.mxu2 %v3570_v50  ;;  %v401_v19 = vadd.f32 %v400_v15, %v374_v14 }
  0xc3   : > { %v481_v20 = vpop.f32.mrf.mxu3  ;;  %2386 = vmatpush.msrb.mxu3 %v2385_v12  ;;  %v423_v22 = vpop.f32.mrf.mxu1  ;;  %2096 = vmatmul.f32.vlgmr.msrb.gmra.mxu0 %v3283_v18 }
  0xc4   : > { %v450_v23 = vpop.f32.mrf.mxu2  ;;  %2351 = vmatpush.msrb.mxu2 %v3575_v52  ;;  %v424_v27 = vadd.f32 %v423_v22, %v401_v19  ;;  %2301 = vmatpush.msrb.mxu0 %v2218_v57 }
  0xc5   : > { %v482_v29 = vadd.f32 %v481_v20, %v450_v23 }
  0xc6   : > { %2811 = vst [vmem:[%s3641_s23] sm:$0xff] %v424_v27  ;;  %2121 = vmatmul.f32.vlgmr.msrb.gmra.mxu1 %v3294_v25  ;;  %2305 = vmatpush.msrb.mxu0 %v2224_v59 }
  0xc7   : > { %2326 = vmatpush.msrb.mxu1 %v3567_v48  ;;  %v2537_v48 = vsub.f32 %v3650_v32, %v2536_v42 }
  0xc8   : > { %2280 = vmatmul.f32.vlgmr.msra.gmra.mxu3 %v3294_v25  ;;  %v507_v33 = vpop.f32.mrf.mxu0  ;;  %2255 = vmatmul.f32.vlgmr.msra.gmra.mxu2 %v3283_v18 }
  0xc9   : > { %2485 = vmatpush.msra.mxu3 %v3570_v50  ;;  %v508_v35 = vadd.f32 %v507_v33, %v482_v29  ;;  %2328 = vmatpush.msrb.mxu1 %v3572_v51 }
  0xca   : > { %2460 = vmatpush.msra.mxu2 %v2377_v58  ;;  %v2538_v58 = vand.u32 4294901760, %v2537_v48 }
  0xcb   : > { %v582_v37 = vpop.f32.mrf.mxu3  ;;  %2487 = vmatpush.msra.mxu3 %v3575_v52  ;;  %v532_v40 = vpop.f32.mrf.mxu1  ;;  %2198 = vmatmul.f32.vlgmr.msra.gmra.mxu0 %v3311_v38 }
  0xcc   : > { %v559_v41 = vpop.f32.mrf.mxu2  ;;  %2464 = vmatpush.msra.mxu2 %v2383_v60  ;;  %v533_v43 = vadd.f32 %v532_v40, %v508_v35  ;;  %2408 = vmatpush.msra.mxu0 %v3585_v54  ;;  %v2543_v54 = vsub.f32 %v3661_v36, %v2542_v45 }
  0xce   : > { %v560_v46 = vadd.f32 %v559_v41, %v533_v43  ;;  %2229 = vmatmul.f32.vlgmr.msra.gmra.mxu1 %v3273_v9  ;;  %2411 = vmatpush.msra.mxu0 %v3593_v56  ;;  %v2544_v60 = vand.u32 4294901760, %v2543_v54 }
  0xcf   : > { %2433 = vmatpush.msra.mxu1 %v3570_v50  ;;  %v2702_v50 = vsub.f32 %v3665_v39, %v2701_v47 }
  0xd0   : > { %2388 = vmatmul.f32.vlgmr.msrb.gmra.mxu3 %v3273_v9  ;;  %v583_v49 = vadd.f32 %v582_v37, %v560_v46  ;;  %v609_v51 = vpop.f32.mrf.mxu0  ;;  %2357 = vmatmul.f32.vlgmr.msrb.gmra.mxu2 %v3311_v38 }
  0xd1   : > { %2592 = vmatpush.msrb.mxu3 %v3634_v24  ;;  %2435 = vmatpush.msra.mxu1 %v3575_v52  ;;  %v2697_v52 = vand.u32 4294901760, %v2696_v53  ;;  %v2703_v62 = vand.u32 4294901760, %v2702_v50 }
  0xd2   : > { %2567 = vmatpush.msrb.mxu2 %v3650_v32  ;;  %2812 = vst [vmem:[%s3641_s23 + $0x8] sm:$0xff] %v583_v49 }
  0xd3   : > { %v691_v55 = vpop.f32.mrf.mxu3  ;;  %2594 = vmatpush.msrb.mxu3 %v3639_v30  ;;  %v640_v56 = vpop.f32.mrf.mxu1  ;;  %2307 = vmatmul.f32.vlgmr.msrb.gmra.mxu0 %v3273_v9 }
  0xd4   : > { %v666_v57 = vpop.f32.mrf.mxu2  ;;  %2570 = vmatpush.msrb.mxu2 %v3661_v36  ;;  %v641_v59 = vadd.f32 %v640_v56, %v609_v51  ;;  %2508 = vmatpush.msrb.mxu0 %v3634_v24 }
  0xd6   : > { %v667_v61 = vadd.f32 %v666_v57, %v641_v59  ;;  %2330 = vmatmul.f32.vlgmr.msrb.gmra.mxu1 %v3273_v9  ;;  %2510 = vmatpush.msrb.mxu0 %v3639_v30 }
  0xd7   : > { %2539 = vmatpush.msrb.mxu1 %v2538_v58 }
  0xd8   : > { %2489 = vmatmul.f32.vlgmr.msra.gmra.mxu3 %v3273_v9  ;;  %v692_v63 = vadd.f32 %v691_v55, %v667_v61  ;;  %v718_v0 = vpop.f32.mrf.mxu0  ;;  %2466 = vmatmul.f32.vlgmr.msra.gmra.mxu2 %v3273_v9 }
  0xd9   : > { %2698 = vmatpush.msra.mxu3 %v2697_v52  ;;  %2545 = vmatpush.msrb.mxu1 %v2544_v60 }
  0xda   : > { %2667 = vmatpush.msra.mxu2 %v3637_v28  ;;  %v719_v1 = vadd.f32 %v718_v0, %v692_v63 }
  0xdb   : > { %v799_v2 = vpop.f32.mrf.mxu3  ;;  %2704 = vmatpush.msra.mxu3 %v2703_v62  ;;  %v741_v3 = vpop.f32.mrf.mxu1  ;;  %2414 = vmatmul.f32.vlgmr.msra.gmra.mxu0 %v3283_v18 }
  0xdc   : > { %v768_v4 = vpop.f32.mrf.mxu2  ;;  %2669 = vmatpush.msra.mxu2 %v3645_v31  ;;  %v742_v5 = vadd.f32 %v741_v3, %v719_v1  ;;  %2619 = vmatpush.msra.mxu0 %v2536_v42 }
  0xdd   : > { %v800_v6 = vadd.f32 %v799_v2, %v768_v4 }
  0xde   : > { %2813 = vst [vmem:[%s3641_s23 + $0x10] sm:$0xff] %v742_v5  ;;  %2439 = vmatmul.f32.vlgmr.msra.gmra.mxu1 %v3294_v25  ;;  %2623 = vmatpush.msra.mxu0 %v2542_v45 }
  0xdf   : > { %2644 = vmatpush.msra.mxu1 %v3634_v24 }
  0xe0   : > { %2598 = vmatmul.f32.vlgmr.msrb.gmra.mxu3 %v3294_v25  ;;  %v825_v7 = vpop.f32.mrf.mxu0  ;;  %2573 = vmatmul.f32.vlgmr.msrb.gmra.mxu2 %v3283_v18 }
  0xe1   : > { %2803 = vmatpush.msrb.mxu3 %v3637_v28  ;;  %v826_v8 = vadd.f32 %v825_v7, %v800_v6  ;;  %2646 = vmatpush.msra.mxu1 %v3639_v30 }
  0xe2   : > { %2778 = vmatpush.msrb.mxu2 %v2695_v44 }
  0xe3   : > { %v900_v10 = vpop.f32.mrf.mxu3  ;;  %2805 = vmatpush.msrb.mxu3 %v3645_v31  ;;  %v850_v11 = vpop.f32.mrf.mxu1  ;;  %2516 = vmatmul.f32.vlgmr.msrb.gmra.mxu0 %v3311_v38 }
  0xe4   : > { %v877_v12 = vpop.f32.mrf.mxu2  ;;  %2782 = vmatpush.msrb.mxu2 %v2701_v47  ;;  %v851_v13 = vadd.f32 %v850_v11, %v826_v8  ;;  %2726 = vmatpush.msrb.mxu0 %v3655_v34 }
  0xe6   : > { %v878_v14 = vadd.f32 %v877_v12, %v851_v13  ;;  %2547 = vmatmul.f32.vlgmr.msrb.gmra.mxu1 %v3273_v9  ;;  %2729 = vmatpush.msrb.mxu0 %v3665_v39 }
  0xe7   : > { %2751 = vmatpush.msrb.mxu1 %v3637_v28 }
  0xe8   : > { %2706 = vmatmul.f32.vlgmr.msra.gmra.mxu3 %v3273_v9  ;;  %v901_v15 = vadd.f32 %v900_v10, %v878_v14  ;;  %v927_v16 = vpop.f32.mrf.mxu0  ;;  %2675 = vmatmul.f32.vlgmr.msra.gmra.mxu2 %v3311_v38 }
  0xe9   : > { %2753 = vmatpush.msrb.mxu1 %v3645_v31 }
  0xea   : > { %2814 = vst [vmem:[%s3641_s23 + $0x18] sm:$0xff] %v901_v15 }
  0xeb   : > { %v1009_v17 = vpop.f32.mrf.mxu3  ;;  %v958_v19 = vpop.f32.mrf.mxu1  ;;  %2625 = vmatmul.f32.vlgmr.msra.gmra.mxu0 %v3273_v9 }
  0xec   : > { %v984_v20 = vpop.f32.mrf.mxu2  ;;  %v959_v21 = vadd.f32 %v958_v19, %v927_v16 }
  0xee   : > { %v985_v22 = vadd.f32 %v984_v20, %v959_v21  ;;  %2648 = vmatmul.f32.vlgmr.msra.gmra.mxu1 %v3273_v9 }
  0xf0   : > { %2807 = vmatmul.f32.vlgmr.msrb.gmra.mxu3 %v3273_v9  ;;  %v1010_v23 = vadd.f32 %v1009_v17, %v985_v22  ;;  %v1036_v24 = vpop.f32.mrf.mxu0  ;;  %2784 = vmatmul.f32.vlgmr.msrb.gmra.mxu2 %v3273_v9 }
  0xf2   : > { %v1037_v38 = vadd.f32 %v1036_v24, %v1010_v23 }
  0xf3   : > { %v1117_v26 = vpop.f32.mrf.mxu3  ;;  %v1059_v27 = vpop.f32.mrf.mxu1  ;;  %2732 = vmatmul.f32.vlgmr.msrb.gmra.mxu0 %v3283_v18 }
  0xf4   : > { %v1086_v28 = vpop.f32.mrf.mxu2  ;;  %v1060_v29 = vadd.f32 %v1059_v27, %v1037_v38 }
  0xf5   : > { %v1118_v30 = vadd.f32 %v1117_v26, %v1086_v28 }
  0xf6   : > { %2815 = vst [vmem:[%s3641_s23 + $0x20] sm:$0xff] %v1060_v29  ;;  %2757 = vmatmul.f32.vlgmr.msrb.gmra.mxu1 %v3294_v25 }
  0xf8   : > { %v1143_v31 = vpop.f32.mrf.mxu0 }
  0xf9   : > { %v1144_v32 = vadd.f32 %v1143_v31, %v1118_v30 }
  0xfb   : > { %v1218_v33 = vpop.f32.mrf.mxu3  ;;  %v1168_v34 = vpop.f32.mrf.mxu1 }
  0xfc   : > { %v1195_v35 = vpop.f32.mrf.mxu2  ;;  %v1169_v36 = vadd.f32 %v1168_v34, %v1144_v32 }
  0xfe   : > { %v1196_v37 = vadd.f32 %v1195_v35, %v1169_v36 }
 0x100   : > { %v1219_v9 = vadd.f32 %v1218_v33, %v1196_v37  ;;  %v1245_v39 = vpop.f32.mrf.mxu0 }
 0x102   : > { %2816 = vst [vmem:[%s3641_s23 + $0x28] sm:$0xff] %v1219_v9 }
 0x103   : > { %v1327_v40 = vpop.f32.mrf.mxu3  ;;  %v1276_v41 = vpop.f32.mrf.mxu1 }
 0x104   : > { %v1302_v18 = vpop.f32.mrf.mxu2  ;;  %v1277_v42 = vadd.f32 %v1276_v41, %v1245_v39 }
 0x106   : > { %v1303_v43 = vadd.f32 %v1302_v18, %v1277_v42 }
 0x108   : > { %v1328_v44 = vadd.f32 %v1327_v40, %v1303_v43  ;;  %v1354_v45 = vpop.f32.mrf.mxu0 }
 0x10a   : > { %v1355_v46 = vadd.f32 %v1354_v45, %v1328_v44 }
 0x10b   : > { %v1435_v25 = vpop.f32.mrf.mxu3  ;;  %v1377_v47 = vpop.f32.mrf.mxu1 }
 0x10c   : > { %v1404_v48 = vpop.f32.mrf.mxu2  ;;  %v1378_v49 = vadd.f32 %v1377_v47, %v1355_v46 }
 0x10d   : > { %v1436_v51 = vadd.f32 %v1435_v25, %v1404_v48 }
 0x10e   : > { %2817 = vst [vmem:[%s3641_s23 + $0x30] sm:$0xff] %v1378_v49 }
 0x110   : > { %v1461_v53 = vpop.f32.mrf.mxu0 }
 0x111   : > { %v1462_v54 = vadd.f32 %v1461_v53, %v1436_v51 }
 0x113   : > { %v1536_v55 = vpop.f32.mrf.mxu3  ;;  %v1486_v50 = vpop.f32.mrf.mxu1 }
 0x114   : > { %v1513_v56 = vpop.f32.mrf.mxu2  ;;  %v1487_v57 = vadd.f32 %v1486_v50, %v1462_v54 }
 0x116   : > { %v1514_v58 = vadd.f32 %v1513_v56, %v1487_v57 }
 0x118   : > { %v1537_v59 = vadd.f32 %v1536_v55, %v1514_v58  ;;  %v1563_v52 = vpop.f32.mrf.mxu0 }
 0x11a   : > { %2818 = vst [vmem:[%s3641_s23 + $0x38] sm:$0xff] %v1537_v59 }
 0x11b   : > { %v1645_v60 = vpop.f32.mrf.mxu3  ;;  %v1594_v61 = vpop.f32.mrf.mxu1 }
 0x11c   : > { %v1620_v62 = vpop.f32.mrf.mxu2  ;;  %v1595_v63 = vadd.f32 %v1594_v61, %v1563_v52 }
 0x11e   : > { %v1621_v0 = vadd.f32 %v1620_v62, %v1595_v63 }
 0x120   : > { %v1646_v1 = vadd.f32 %v1645_v60, %v1621_v0  ;;  %v1672_v2 = vpop.f32.mrf.mxu0 }
 0x122   : > { %v1673_v3 = vadd.f32 %v1672_v2, %v1646_v1 }
 0x123   : > { %v1753_v4 = vpop.f32.mrf.mxu3  ;;  %v1695_v5 = vpop.f32.mrf.mxu1 }
 0x124   : > { %v1722_v6 = vpop.f32.mrf.mxu2  ;;  %v1696_v7 = vadd.f32 %v1695_v5, %v1673_v3 }
 0x125   : > { %v1754_v8 = vadd.f32 %v1753_v4, %v1722_v6 }
 0x126   : > { %2819 = vst [vmem:[%s3641_s23 + $0x40] sm:$0xff] %v1696_v7 }
 0x128   : > { %v1779_v10 = vpop.f32.mrf.mxu0 }
 0x129   : > { %v1780_v11 = vadd.f32 %v1779_v10, %v1754_v8 }
 0x12b   : > { %v1854_v12 = vpop.f32.mrf.mxu3  ;;  %v1804_v13 = vpop.f32.mrf.mxu1 }
 0x12c   : > { %v1831_v14 = vpop.f32.mrf.mxu2  ;;  %v1805_v15 = vadd.f32 %v1804_v13, %v1780_v11 }
 0x12e   : > { %v1832_v16 = vadd.f32 %v1831_v14, %v1805_v15 }
 0x130   : > { %v1855_v17 = vadd.f32 %v1854_v12, %v1832_v16  ;;  %v1881_v19 = vpop.f32.mrf.mxu0 }
 0x132   : > { %2820 = vst [vmem:[%s3641_s23 + $0x48] sm:$0xff] %v1855_v17 }
 0x133   : > { %v1963_v20 = vpop.f32.mrf.mxu3  ;;  %v1912_v21 = vpop.f32.mrf.mxu1 }
 0x134   : > { %v1938_v22 = vpop.f32.mrf.mxu2  ;;  %v1913_v23 = vadd.f32 %v1912_v21, %v1881_v19 }
 0x136   : > { %v1939_v24 = vadd.f32 %v1938_v22, %v1913_v23 }
 0x138   : > { %v1964_v38 = vadd.f32 %v1963_v20, %v1939_v24  ;;  %v1990_v26 = vpop.f32.mrf.mxu0 }
 0x13a   : > { %v1991_v27 = vadd.f32 %v1990_v26, %v1964_v38 }
 0x13b   : > { %v2071_v28 = vpop.f32.mrf.mxu3  ;;  %v2013_v29 = vpop.f32.mrf.mxu1 }
 0x13c   : > { %v2040_v30 = vpop.f32.mrf.mxu2  ;;  %v2014_v31 = vadd.f32 %v2013_v29, %v1991_v27 }
 0x13d   : > { %v2072_v32 = vadd.f32 %v2071_v28, %v2040_v30 }
 0x13e   : > { %2821 = vst [vmem:[%s3641_s23 + $0x50] sm:$0xff] %v2014_v31 }
 0x140   : > { %v2097_v33 = vpop.f32.mrf.mxu0 }
 0x141   : > { %v2098_v34 = vadd.f32 %v2097_v33, %v2072_v32 }
 0x143   : > { %v2172_v35 = vpop.f32.mrf.mxu3  ;;  %v2122_v36 = vpop.f32.mrf.mxu1 }
 0x144   : > { %v2149_v37 = vpop.f32.mrf.mxu2  ;;  %v2123_v9 = vadd.f32 %v2122_v36, %v2098_v34 }
 0x146   : > { %v2150_v39 = vadd.f32 %v2149_v37, %v2123_v9 }
 0x148   : > { %v2173_v40 = vadd.f32 %v2172_v35, %v2150_v39  ;;  %v2199_v41 = vpop.f32.mrf.mxu0 }
 0x14a   : > { %2822 = vst [vmem:[%s3641_s23 + $0x58] sm:$0xff] %v2173_v40 }
 0x14b   : > { %v2281_v18 = vpop.f32.mrf.mxu3  ;;  %v2230_v42 = vpop.f32.mrf.mxu1 }
 0x14c   : > { %v2256_v43 = vpop.f32.mrf.mxu2  ;;  %v2231_v44 = vadd.f32 %v2230_v42, %v2199_v41 }
 0x14e   : > { %v2257_v45 = vadd.f32 %v2256_v43, %v2231_v44 }
 0x150   : > { %v2282_v46 = vadd.f32 %v2281_v18, %v2257_v45  ;;  %v2308_v25 = vpop.f32.mrf.mxu0 }
 0x152   : > { %v2309_v47 = vadd.f32 %v2308_v25, %v2282_v46 }
 0x153   : > { %v2389_v48 = vpop.f32.mrf.mxu3  ;;  %v2331_v49 = vpop.f32.mrf.mxu1 }
 0x154   : > { %v2358_v51 = vpop.f32.mrf.mxu2  ;;  %v2332_v53 = vadd.f32 %v2331_v49, %v2309_v47 }
 0x155   : > { %v2390_v54 = vadd.f32 %v2389_v48, %v2358_v51 }
 0x156   : > { %2823 = vst [vmem:[%s3641_s23 + $0x60] sm:$0xff] %v2332_v53 }
 0x158   : > { %v2415_v55 = vpop.f32.mrf.mxu0 }
 0x159   : > { %v2416_v50 = vadd.f32 %v2415_v55, %v2390_v54 }
 0x15b   : > { %v2490_v56 = vpop.f32.mrf.mxu3  ;;  %v2440_v57 = vpop.f32.mrf.mxu1 }
 0x15c   : > { %v2467_v58 = vpop.f32.mrf.mxu2  ;;  %v2441_v59 = vadd.f32 %v2440_v57, %v2416_v50 }
 0x15e   : > { %v2468_v52 = vadd.f32 %v2467_v58, %v2441_v59 }
 0x160   : > { %v2491_v60 = vadd.f32 %v2490_v56, %v2468_v52  ;;  %v2517_v61 = vpop.f32.mrf.mxu0 }
 0x162   : > { %2824 = vst [vmem:[%s3641_s23 + $0x68] sm:$0xff] %v2491_v60 }
 0x163   : > { %v2599_v62 = vpop.f32.mrf.mxu3  ;;  %v2548_v63 = vpop.f32.mrf.mxu1 }
 0x164   : > { %v2574_v0 = vpop.f32.mrf.mxu2  ;;  %v2549_v1 = vadd.f32 %v2548_v63, %v2517_v61 }
 0x166   : > { %v2575_v2 = vadd.f32 %v2574_v0, %v2549_v1 }
 0x168   : > { %v2600_v3 = vadd.f32 %v2599_v62, %v2575_v2  ;;  %v2626_v4 = vpop.f32.mrf.mxu0 }
 0x16a   : > { %v2627_v5 = vadd.f32 %v2626_v4, %v2600_v3 }
 0x16b   : > { %v2707_v6 = vpop.f32.mrf.mxu3  ;;  %v2649_v7 = vpop.f32.mrf.mxu1 }
 0x16c   : > { %v2676_v8 = vpop.f32.mrf.mxu2  ;;  %v2650_v10 = vadd.f32 %v2649_v7, %v2627_v5 }
 0x16d   : > { %v2708_v11 = vadd.f32 %v2707_v6, %v2676_v8 }
 0x16e   : > { %2825 = vst [vmem:[%s3641_s23 + $0x70] sm:$0xff] %v2650_v10 }
 0x170   : > { %v2733_v12 = vpop.f32.mrf.mxu0 }
 0x171   : > { %v2734_v13 = vadd.f32 %v2733_v12, %v2708_v11 }
 0x173   : > { %v2758_v14 = vpop.f32.mrf.mxu1  ;;  %v2808_v17 = vpop.f32.mrf.mxu3 }
 0x174   : > { %v2785_v15 = vpop.f32.mrf.mxu2  ;;  %v2759_v16 = vadd.f32 %v2758_v14, %v2734_v13 }
 0x176   : > { %v2786_v19 = vadd.f32 %v2785_v15, %v2759_v16 }
 0x178   : > { %v2809_v20 = vadd.f32 %v2808_v17, %v2786_v19 }
 0x17a   : > { %2826 = vst [vmem:[%s3641_s23 + $0x78] sm:$0xff] %v2809_v20 }
 0x17b   : > { %3091 = shalt.err (!%p3088_p8)
}
 0x17c   : > { %2950 = dma.vmem_to_hbm [thread:$0]  (%p3207_p11), %s2842_s19, 2048, %s2844_s25, %s2828_s26  }
 0x17d PF: > { %s2855_s6 = sand.u32 1, %s3122_s9   ;;  %p3777_p9 = scmp.ge.s32.totalorder %s3134_s12, 2 }
 0x17e   : > { %s2856_s7 = scalar_lea.sflag [#allocation4], %s2855_s6 }
 0x17f   : > { %p2961_p10 = pnand %p3777_p9, %p3211_p12 }
 0x181   : > { %p2962_p1 = pneg %p2961_p10 }
 0x183   : > { %3117 = dma.done.wait (%p2962_p1), %s2856_s7, 2048  }
 0x184   : > { %3119 = vsyncadd (%p2962_p1), %s2856_s7, 4294965248  ;;  %p16_p2 = scmp.ge.s32.totalorder %s3180_s15, 4   ;;  %s3778_s9 = smov %s3126_s10 }
 0x185   : > { %s3779_s10 = smov %s3130_s11  ;;  %s3780_s11 = smov %s3192_s18 }
 0x186   : > { %s3781_s12 = smov %s3180_s15  ;;  %18 = sbr.rel (!%p16_p2) target bundleno = 6 (0x6), region = 78 }
 0x18b   :  { %2862 = vsyncpa [#allocation3], 1 }
 0x18c   :  { %2864 = vsyncpa [#allocation3 + $0x1], 1 }
 0x18d   :  { %2865 = vsyncpa [#allocation6], 1 }
 0x18e   :  { %2867 = vsyncpa [#allocation6 + $0x1], 1 }
 0x18f   :  { %2868 = vsyncpa [#allocation4], 1 }
 0x190   :  { %2870 = vsyncpa [#allocation4 + $0x1], 1 }

</bundles_post_ra>
